<compile_context>
chip_gen: v6e
topology: v6e:2x2x1
jax: 0.10.0
libtpu: 0.0.40
codegen_flags: <defaults>
</compile_context>

<pallas_src>
import jax
import jax.numpy as jnp
from jax import lax
from jax.experimental import pallas as pl
from jax.experimental.pallas import tpu as pltpu

H1, H2 = 64, 32                        # hidden sizes from the PyTorch module
MAX_TILE_B = 16384                     # cap on batch lanes per grid step
VMEM_BUDGET_BYTES = 24 * 1024 * 1024   # conservative across v5e / v6e / v7x
VMEM_LIMIT_BYTES = 32 * 1024 * 1024    # raise v5e's 16 MiB default, safe on v7x


def dqn_mlp_kernel(x_ref, w1_ref, b1_ref, w2_ref, b2_ref, w3_ref, b3_ref, oT_ref):
    # x_ref : [TILE_B, input_size] bf16 (batch-major, exactly as in HBM)
    # wN_ref: PyTorch-layout [out_features, in_features] bf16 (resident in VMEM)
    # bN_ref: [out_features, 1] f32
    # oT_ref: [output_size, TILE_B] f32 (batch on lanes -> lane-dense stores)

    # Layer 1: contract the shared in_features axis -> result is already [H1, TILE_B].
    h1 = lax.dot_general(
        w1_ref[...], x_ref[...],
        dimension_numbers=(((1,), (1,)), ((), ())),
        preferred_element_type=jnp.float32)
    h1 = jnp.maximum(h1 + b1_ref[...], 0.0)

    h2 = jnp.dot(w2_ref[...], h1.astype(jnp.bfloat16),
                 preferred_element_type=jnp.float32)
    h2 = jnp.maximum(h2 + b2_ref[...], 0.0)

    out = jnp.dot(w3_ref[...], h2.astype(jnp.bfloat16),
                  preferred_element_type=jnp.float32)
    oT_ref[...] = (out + b3_ref[...]).astype(oT_ref.dtype)


def prepare_dqn_params(params):
    """One-time param prep (hoisted out of the per-call path): weights keep the
    PyTorch [out, in] layout but are cast to bf16 (MXU operands); biases become
    f32 [out, 1] columns so bias + ReLU stay in f32 on the VPU."""
    return {
        "w1": params["w1"].astype(jnp.bfloat16),
        "b1": params["b1"][:, None].astype(jnp.float32),
        "w2": params["w2"].astype(jnp.bfloat16),
        "b2": params["b2"][:, None].astype(jnp.float32),
        "w3": params["w3"].astype(jnp.bfloat16),
        "b3": params["b3"][:, None].astype(jnp.float32),
    }


def _round_up(v, m):
    return pl.cdiv(v, m) * m


def _pick_tiling(B, input_size, output_size):
    """Choose (tile_b, B_pad): lane-dense tiles (multiple of 128) sized against a
    VMEM budget (double-buffered I/O tiles with their lane/sublane padding plus the
    h1/h2 scratch), and >=2 grid steps whenever the padded batch allows it so both
    v7x TensorCores get work."""
    bytes_per_lane = (
        2 * 2 * _round_up(input_size, 128)    # bf16 x tile (in_features on lanes), 2 buffers
        + 2 * 4 * _round_up(output_size, 8)   # f32 out tile (out_features on sublanes), 2 buffers
        + 6 * (H1 + H2))                      # f32 h1/h2 intermediates + bf16 re-casts
    vmem_lanes = max(128, (VMEM_BUDGET_BYTES // bytes_per_lane) // 128 * 128)
    tile_cap = min(MAX_TILE_B, vmem_lanes)

    B128 = max(128, _round_up(B, 128))        # batch rounded up to full lanes
    half = max(128, pl.cdiv(B128, 256) * 128)  # ~half the batch, still lane-dense
    tile_b = 128 if B128 == 128 else min(tile_cap, half)
    B_pad = _round_up(B128, tile_b)
    return tile_b, B_pad


@jax.jit
def dqn_forward_T(x, p):
    """Heavy path. x: [B, input_size] float; p: output of prepare_dqn_params.
    Returns Q-values feature-major: [output_size, B] f32 (sliced, never transposed,
    so the kernel's lane-dense store win is not paid back outside the kernel)."""
    B, input_size = x.shape
    output_size = p["w3"].shape[0]
    tile_b, B_pad = _pick_tiling(B, input_size, output_size)
    grid = (B_pad // tile_b,)

    xb = x.astype(jnp.bfloat16)
    if B_pad != B:
        xb = jnp.pad(xb, ((0, B_pad - B), (0, 0)))   # zero rows; sliced off below

    resident = lambda i: (0, 0)   # weights/biases: same block every step -> stay in VMEM
    flops = 2 * B_pad * (input_size * H1 + H1 * H2 + H2 * output_size)
    bytes_accessed = (2 * B_pad * input_size + 4 * B_pad * output_size
                      + 2 * (H1 * input_size + H2 * H1 + output_size * H2)
                      + 4 * (H1 + H2 + output_size))

    outT = pl.pallas_call(
        dqn_mlp_kernel,
        out_shape=jax.ShapeDtypeStruct((output_size, B_pad), jnp.float32),
        grid=grid,
        in_specs=[
            pl.BlockSpec((tile_b, input_size), lambda i: (i, 0)),   # x tile (batch-major)
            pl.BlockSpec((H1, input_size), resident),               # w1
            pl.BlockSpec((H1, 1), resident),                        # b1
            pl.BlockSpec((H2, H1), resident),                       # w2
            pl.BlockSpec((H2, 1), resident),                        # b2
            pl.BlockSpec((output_size, H2), resident),              # w3
            pl.BlockSpec((output_size, 1), resident),               # b3
        ],
        out_specs=pl.BlockSpec((output_size, tile_b), lambda i: (0, i)),
        compiler_params=pltpu.CompilerParams(
            dimension_semantics=("parallel",),          # v7x: 2 TCs split the batch tiles
            vmem_limit_bytes=VMEM_LIMIT_BYTES),
        cost_estimate=pl.CostEstimate(
            flops=flops, transcendentals=0, bytes_accessed=bytes_accessed),
    )(xb, p["w1"], p["b1"], p["w2"], p["b2"], p["w3"], p["b3"])

    return outT[:, :B]


@jax.jit
def dqn_forward(x, p):
    """PyTorch-facing forward: [B, input_size] -> [B, output_size] (tiny transpose
    of the [output_size, B] slab; heavy consumers should use dqn_forward_T)."""
    return dqn_forward_T(x, p).T


def init_dqn_params(key, input_size, output_size):
    """Deterministic PyTorch-style init (uniform(-1/sqrt(fan_in), 1/sqrt(fan_in)))."""
    dims = [(H1, input_size), (H2, H1), (output_size, H2)]
    params = {}
    for i, (fan_out, fan_in) in enumerate(dims, start=1):
        key, kw, kb = jax.random.split(key, 3)
        bound = 1.0 / (fan_in ** 0.5)
        params[f"w{i}"] = jax.random.uniform(
            kw, (fan_out, fan_in), jnp.float32, minval=-bound, maxval=bound)
        params[f"b{i}"] = jax.random.uniform(
            kb, (fan_out,), jnp.float32, minval=-bound, maxval=bound)
    return params


def dqn_reference(x, params, matmul_dtype=jnp.float32):
    """Pure-JAX reference; matmul_dtype=jnp.bfloat16 emulates the kernel's MXU casts."""
    def lin(a, w, b):
        y = jnp.dot(a.astype(matmul_dtype), w.T.astype(matmul_dtype),
                    preferred_element_type=jnp.float32)
        return y + b
    h1 = jnp.maximum(lin(x, params["w1"], params["b1"]), 0.0)
    h2 = jnp.maximum(lin(h1, params["w2"], params["b2"]), 0.0)
    return lin(h2, params["w3"], params["b3"])


if __name__ == "__main__":
    key = jax.random.PRNGKey(0)
    input_size, output_size = 16, 4

    kp, kx_small, kx_big = jax.random.split(key, 3)
    params = init_dqn_params(kp, input_size, output_size)
    prepped = prepare_dqn_params(params)   # one-time prep, not per inference call

    # Tiny batch (grid collapses to 1 step) and a ragged batch (padding + >=2 steps).
    for batch, kk in ((8, kx_small), (300, kx_big)):
        x = jax.random.normal(kk, (batch, input_size), jnp.float32)
        out = jax.block_until_ready(dqn_forward(x, prepped))
        assert out.shape == (batch, output_size)

        ref_bf16 = dqn_reference(x, params, matmul_dtype=jnp.bfloat16)
        ref_f32 = dqn_reference(x, params)
        assert jnp.allclose(out, ref_bf16, atol=2e-3, rtol=2e-3), "mismatch vs bf16 reference"
        assert jnp.allclose(out, ref_f32, atol=3e-2, rtol=3e-2), "mismatch vs f32 reference"

    print("KERNEL_OK")
</pallas_src>

<mosaic_0001>
module attributes {stable_mosaic.version = 11 : i64} {
  func.func @dqn_mlp_kernel(%arg0: i32, %arg1: memref<128x16xbf16, #tpu.memory_space<vmem>>, %arg2: memref<64x16xbf16, #tpu.memory_space<vmem>>, %arg3: memref<64x1xf32, #tpu.memory_space<vmem>>, %arg4: memref<32x64xbf16, #tpu.memory_space<vmem>>, %arg5: memref<32x1xf32, #tpu.memory_space<vmem>>, %arg6: memref<4x32xbf16, #tpu.memory_space<vmem>>, %arg7: memref<4x1xf32, #tpu.memory_space<vmem>>, %arg8: memref<4x128xf32, #tpu.memory_space<vmem>>) attributes {dimension_semantics = [#tpu.dimension_semantics<parallel>], iteration_bounds = array<i64: 1>, scalar_prefetch = 0 : i64, scratch_operands = 0 : i64, tpu.core_type = #tpu.core_type<tc>, window_params = [{transform_indices = @transform_0, window_bounds = array<i64: 128, 16>}, {pipeline_mode = #tpu.pipeline_mode<synchronous>, transform_indices = @transform_1, window_bounds = array<i64: 64, 16>}, {pipeline_mode = #tpu.pipeline_mode<synchronous>, transform_indices = @transform_2, window_bounds = array<i64: 64, 1>}, {pipeline_mode = #tpu.pipeline_mode<synchronous>, transform_indices = @transform_3, window_bounds = array<i64: 32, 64>}, {pipeline_mode = #tpu.pipeline_mode<synchronous>, transform_indices = @transform_4, window_bounds = array<i64: 32, 1>}, {pipeline_mode = #tpu.pipeline_mode<synchronous>, transform_indices = @transform_5, window_bounds = array<i64: 4, 32>}, {pipeline_mode = #tpu.pipeline_mode<synchronous>, transform_indices = @transform_6, window_bounds = array<i64: 4, 1>}, {transform_indices = @transform_7, window_bounds = array<i64: 4, 128>}]} {
    %c0 = arith.constant 0 : index
    %c0_0 = arith.constant 0 : index
    %0 = vector.load %arg2[%c0, %c0_0] : memref<64x16xbf16, #tpu.memory_space<vmem>>, vector<64x16xbf16>
    %c0_1 = arith.constant 0 : index
    %c0_2 = arith.constant 0 : index
    %1 = vector.load %arg1[%c0_1, %c0_2] : memref<128x16xbf16, #tpu.memory_space<vmem>>, vector<128x16xbf16>
    %cst = arith.constant dense<0.000000e+00> : vector<64x128xf32>
    %2 = tpu.matmul %0, %1, %cst {dimension_numbers = #tpu.dot_dimension_numbers<[1], [1], [0], [0], [0, 0, 1, 0], [], []>} : vector<64x16xbf16>, vector<128x16xbf16>, vector<64x128xf32> -> vector<64x128xf32>
    %c0_3 = arith.constant 0 : index
    %c0_4 = arith.constant 0 : index
    %3 = vector.load %arg3[%c0_3, %c0_4] : memref<64x1xf32, #tpu.memory_space<vmem>>, vector<64x1xf32>
    %4 = vector.broadcast %3 : vector<64x1xf32> to vector<64x128xf32>
    %5 = arith.addf %2, %4 : vector<64x128xf32>
    %cst_5 = arith.constant 0.000000e+00 : f32
    %6 = vector.broadcast %cst_5 : f32 to vector<64x128xf32>
    %7 = arith.maximumf %5, %6 : vector<64x128xf32>
    %c0_6 = arith.constant 0 : index
    %c0_7 = arith.constant 0 : index
    %8 = vector.load %arg4[%c0_6, %c0_7] : memref<32x64xbf16, #tpu.memory_space<vmem>>, vector<32x64xbf16>
    %9 = arith.truncf %7 : vector<64x128xf32> to vector<64x128xbf16>
    %cst_8 = arith.constant dense<0.000000e+00> : vector<32x128xf32>
    %10 = tpu.matmul %8, %9, %cst_8 {dimension_numbers = #tpu.dot_dimension_numbers<[1], [0], [0], [1], [0, 0, 1, 1], [], []>} : vector<32x64xbf16>, vector<64x128xbf16>, vector<32x128xf32> -> vector<32x128xf32>
    %c0_9 = arith.constant 0 : index
    %c0_10 = arith.constant 0 : index
    %11 = vector.load %arg5[%c0_9, %c0_10] : memref<32x1xf32, #tpu.memory_space<vmem>>, vector<32x1xf32>
    %12 = vector.broadcast %11 : vector<32x1xf32> to vector<32x128xf32>
    %13 = arith.addf %10, %12 : vector<32x128xf32>
    %cst_11 = arith.constant 0.000000e+00 : f32
    %14 = vector.broadcast %cst_11 : f32 to vector<32x128xf32>
    %15 = arith.maximumf %13, %14 : vector<32x128xf32>
    %c0_12 = arith.constant 0 : index
    %c0_13 = arith.constant 0 : index
    %16 = vector.load %arg6[%c0_12, %c0_13] : memref<4x32xbf16, #tpu.memory_space<vmem>>, vector<4x32xbf16>
    %17 = arith.truncf %15 : vector<32x128xf32> to vector<32x128xbf16>
    %cst_14 = arith.constant dense<0.000000e+00> : vector<4x128xf32>
    %18 = tpu.matmul %16, %17, %cst_14 {dimension_numbers = #tpu.dot_dimension_numbers<[1], [0], [0], [1], [0, 0, 1, 1], [], []>} : vector<4x32xbf16>, vector<32x128xbf16>, vector<4x128xf32> -> vector<4x128xf32>
    %c0_15 = arith.constant 0 : index
    %c0_16 = arith.constant 0 : index
    %19 = vector.load %arg7[%c0_15, %c0_16] : memref<4x1xf32, #tpu.memory_space<vmem>>, vector<4x1xf32>
    %20 = vector.broadcast %19 : vector<4x1xf32> to vector<4x128xf32>
    %21 = arith.addf %18, %20 : vector<4x128xf32>
    %c0_17 = arith.constant 0 : index
    %c0_18 = arith.constant 0 : index
    %22 = vector.load %arg8[%c0_17, %c0_18] : memref<4x128xf32, #tpu.memory_space<vmem>>, vector<4x128xf32>
    tpu.vector_store %arg8[%c0_17, %c0_18], %21 {strides = array<i32>} : memref<4x128xf32, #tpu.memory_space<vmem>>, vector<4x128xf32>,
    return
  }
  func.func @transform_0(%arg0: i32) -> (i32, i32) {
    %c0_i32 = arith.constant 0 : i32
    %c0_i32_0 = arith.constant 0 : i32
    return %arg0, %c0_i32 : i32, i32
  }
  func.func @transform_1(%arg0: i32) -> (i32, i32) {
    %c0_i32 = arith.constant 0 : i32
    %c0_i32_0 = arith.constant 0 : i32
    %c0_i32_1 = arith.constant 0 : i32
    return %c0_i32, %c0_i32_0 : i32, i32
  }
  func.func @transform_2(%arg0: i32) -> (i32, i32) {
    %c0_i32 = arith.constant 0 : i32
    %c0_i32_0 = arith.constant 0 : i32
    %c0_i32_1 = arith.constant 0 : i32
    return %c0_i32, %c0_i32_0 : i32, i32
  }
  func.func @transform_3(%arg0: i32) -> (i32, i32) {
    %c0_i32 = arith.constant 0 : i32
    %c0_i32_0 = arith.constant 0 : i32
    %c0_i32_1 = arith.constant 0 : i32
    return %c0_i32, %c0_i32_0 : i32, i32
  }
  func.func @transform_4(%arg0: i32) -> (i32, i32) {
    %c0_i32 = arith.constant 0 : i32
    %c0_i32_0 = arith.constant 0 : i32
    %c0_i32_1 = arith.constant 0 : i32
    return %c0_i32, %c0_i32_0 : i32, i32
  }
  func.func @transform_5(%arg0: i32) -> (i32, i32) {
    %c0_i32 = arith.constant 0 : i32
    %c0_i32_0 = arith.constant 0 : i32
    %c0_i32_1 = arith.constant 0 : i32
    return %c0_i32, %c0_i32_0 : i32, i32
  }
  func.func @transform_6(%arg0: i32) -> (i32, i32) {
    %c0_i32 = arith.constant 0 : i32
    %c0_i32_0 = arith.constant 0 : i32
    %c0_i32_1 = arith.constant 0 : i32
    return %c0_i32, %c0_i32_0 : i32, i32
  }
  func.func @transform_7(%arg0: i32) -> (i32, i32) {
    %c0_i32 = arith.constant 0 : i32
    %c0_i32_0 = arith.constant 0 : i32
    return %c0_i32, %arg0 : i32, i32
  }
}

</mosaic_0001>

<bundles_post_ra>
// kernel: dqn_forward_T.1
= control target key start
LH: loop header
LB: loop body
LE: loop exit
PB: predicated region body
PF: predicated region fallthrough
CT: control target
= control target key end

     0   :  { %vm160_vm0 = vcmask 130048   ;;  %v576_v3 = vmov 0   ;;  %s729_s0 = inlined_call_operand.vmem [shape: bf16[128,16], index: 0, kind: input, shape index: {}]   ;;  %s730_s1 = inlined_call_operand.vmem [shape: bf16[64,16], index: 1, kind: input, shape index: {}]   ;;  %s731_s2 = inlined_call_operand.vmem [shape: f32[64,1], index: 2, kind: input, shape index: {}]   ;;  %s732_s3 = inlined_call_operand.vmem [shape: bf16[32,64], index: 3, kind: input, shape index: {}]   ;;  %s733_s4 = inlined_call_operand.vmem [shape: f32[32,1], index: 4, kind: input, shape index: {}]   ;;  %s734_s5 = inlined_call_operand.vmem [shape: bf16[4,32], index: 5, kind: input, shape index: {}]   ;;  %s735_s6 = inlined_call_operand.vmem [shape: f32[4,1], index: 6, kind: input, shape index: {}]   ;;  %s736_s7 = inlined_call_operand.hbm [shape: f32[4,128], index: 7, kind: output, shape index: {}]  }
   0x1   :  { %v540_v0 = vld [vmem:[%s729_s0 + $0x38] sm:$0xff]   ;;  %v541_v1 = vld [vmem:[%s729_s0 + $0x30] sm:$0xff]   ;;  %538 = vset.pattern.permute.xlu0 %v576_v3  ;;  %539 = vset.pattern.permute.xlu1 %v576_v3  ;;  %v542_v4 = vld [vmem:[%s729_s0 + $0x28] sm:$0xff]  }
   0x2   :  { %526 = vmatprep.subr.msk.bf16.mxu0 %vm160_vm0, %v540_v0  ;;  %v195_v2 = vsel %vm160_vm0, %v540_v0, 0  ;;  %v192_v5 = vsel %vm160_vm0, %v541_v1, 0  ;;  %v548_v6 = vld [vmem:[%s730_s1] sm:$0xff]   ;;  %v58_v7 = vld [vmem:[%s731_s2 + $0x30] sm:$0xff]  ;;  %v59_v9 = vld [vmem:[%s731_s2 + $0x38] sm:$0xff]  ;;  %v189_v11 = vsel %vm160_vm0, %v542_v4, 0 }
   0x3   :  { %483 = vmatpush3.bf16.xpose.msra.mxu0 %v195_v2  ;;  %498 = vmatprep.mubr.msk.bf16.mxu0 %vm160_vm0, %v548_v6  ;;  %v56_v8 = vld [vmem:[%s731_s2 + $0x20] sm:$0xff]  ;;  %v57_v10 = vld [vmem:[%s731_s2 + $0x28] sm:$0xff] }
   0x4   :  { %527 = vmatprep.subr.msk.bf16.mxu0 %vm160_vm0, %v541_v1  ;;  %92 = vperm.xlu0 %538, %v58_v7   ;;  %v543_v12 = vld [vmem:[%s729_s0 + $0x20] sm:$0xff]  }
   0x5   :  { %82 = vperm.xlu1 %539, %v56_v8  }
   0x8   :  { %97 = vperm.xlu0 %538, %v59_v9  }
   0x9   :  { %87 = vperm.xlu1 %539, %v57_v10  }
   0xb   :  { %485 = vmatpush3.bf16.xpose.msra.mxu0 %v192_v5 }
   0xc   :  { %528 = vmatprep.subr.msk.bf16.mxu0 %vm160_vm0, %v542_v4 }
   0xd   :  { %12 = vsyncpa [#allocation3], 0  ;;  %v54_v13 = vld [vmem:[%s731_s2 + $0x10] sm:$0xff]  ;;  %v55_v14 = vld [vmem:[%s731_s2 + $0x18] sm:$0xff]  ;;  %v186_v17 = vsel %vm160_vm0, %v543_v12, 0  ;;  %vm312_vm1 = vcmask 523264  }
   0xe   :  { %72 = vperm.xlu0 %538, %v54_v13   ;;  %77 = vperm.xlu1 %539, %v55_v14   ;;  %v52_v15 = vld [vmem:[%s731_s2] sm:$0xff]  ;;  %v53_v16 = vld [vmem:[%s731_s2 + $0x8] sm:$0xff]  ;;  %v544_v18 = vld [vmem:[%s729_s0 + $0x18] sm:$0xff]   ;;  %v577_v8 = vmov 0.0   ;;  %vm578_vm2 = vmmov 0   ;;  %vm381_vm3 = vcmask 261120  }
   0xf   :  { %v280_v19 = vld [vmem:[%s733_s4 + $0x10] sm:$0xff]  ;;  %v281_v20 = vld [vmem:[%s733_s4 + $0x18] sm:$0xff]  ;;  %v278_v21 = vld [vmem:[%s733_s4] sm:$0xff]  ;;  %v183_v23 = vsel %vm160_vm0, %v544_v18, 0  ;;  %s579_s28 = smov [#allocation2]  }
  0x10   :  { %v279_v22 = vld [vmem:[%s733_s4 + $0x8] sm:$0xff]  ;;  %v545_v24 = vld [vmem:[%s729_s0 + $0x10] sm:$0xff]   ;;  %v375_v25 = vld [vmem:[%s735_s6] sm:$0xf]  ;;  %s432_s29 = sshll.u32 %s579_s28, 4  ;;  %s433_s29 = int_to_ptr.vmem [resolvable:$true] %s432_s29 }
  0x11   :  { %v180_v26 = vsel %vm160_vm0, %v545_v24, 0  ;;  %v546_v27 = vld [vmem:[%s729_s0 + $0x8] sm:$0xff]   ;;  %v547_v29 = vld [vmem:[%s729_s0] sm:$0xff]   ;;  %v550_v32 = vld [vmem:[%s730_s1 + $0x10] sm:$0xff]   ;;  %s554_s30 = scalar_lea.vmem %s433_s29, 64  ;;  %p559_p1 = scmp.lt.s32.totalorder %s433_s29, %s433_s29 }
  0x12   :  { %62 = vperm.xlu0 %538, %v52_v15   ;;  %67 = vperm.xlu1 %539, %v53_v16   ;;  %v177_v28 = vsel %vm160_vm0, %v546_v27, 0  ;;  %v174_v30 = vsel %vm160_vm0, %v547_v29, 0  ;;  %v549_v31 = vld [vmem:[%s730_s1 + $0x8] sm:$0xff]   ;;  %v551_v33 = vld [vmem:[%s730_s1 + $0x18] sm:$0xff]   ;;  %v552_v34 = vld [vmem:[%s732_s3] sm:$0xff]   ;;  %p555_p0 = scmp.ne.s32.totalorder %s433_s29, %s554_s30  ;;  %p560_p2 = scmp.lt.s32.totalorder %s554_s30, %s554_s30 }
  0x13   :  { %487 = vmatpush3.bf16.xpose.msra.mxu0 %v189_v11  ;;  %514 = vmatprep.mubr.msk.bf16.mxu1 %vm312_vm1, %v552_v34  ;;  %v553_v7 = vld [vmem:[%s732_s3 + $0x8] sm:$0xff]  }
  0x14   :  { %529 = vmatprep.subr.msk.bf16.mxu0 %vm160_vm0, %v543_v12  ;;  %p561_p3 = por %p560_p2, %p559_p1 }
  0x16   :  { %294 = vperm.xlu0 %538, %v280_v19   ;;  %299 = vperm.xlu1 %539, %v281_v20   ;;  %p562_p4 = pnand %p561_p3, %p555_p0 }
  0x1a   :  { %284 = vperm.xlu0 %538, %v278_v21   ;;  %289 = vperm.xlu1 %539, %v279_v22  }
  0x1b   :  { %489 = vmatpush3.bf16.xpose.msra.mxu0 %v186_v17 }
  0x1c   :  { %530 = vmatprep.subr.msk.bf16.mxu0 %vm160_vm0, %v544_v18 }
  0x1e   :  { %378 = vperm.xlu0 %538, %v375_v25  }
  0x23   :  { %491 = vmatpush3.bf16.xpose.msra.mxu0 %v183_v23 }
  0x24   :  { %531 = vmatprep.subr.msk.bf16.mxu0 %vm160_vm0, %v545_v24 }
  0x2b   :  { %493 = vmatpush3.bf16.xpose.msra.mxu0 %v180_v26 }
  0x2c   :  { %532 = vmatprep.subr.msk.bf16.mxu0 %vm160_vm0, %v546_v27  ;;  %v372_v27 = vld [vmem:[%s734_s5] sm:$0x3] }
  0x33   :  { %495 = vmatpush3.bf16.xpose.msra.mxu0 %v177_v28 }
  0x34   :  { %533 = vmatprep.subr.msk.bf16.mxu0 %vm160_vm0, %v547_v29 }
  0x3b   :  { %497 = vmatpush3.bf16.xpose.msra.mxu0 %v174_v30 }
  0x42   :  { %499 = vmatmul.mubr.msk.bf16.vlgmr.msra.gmra.mxu0 %vm160_vm0, %v549_v31 }
  0x43   :  { %502 = vmatprep.mubr.msk.bf16.mxu0 %vm160_vm0, %v550_v32 }
  0x4a   :  { %503 = vmatmul.mubr.msk.bf16.gmra.mxu0 %vm160_vm0, %v551_v33 }
  0x7f   :  { %v93_v37 = vpop.permute.xlu0 %92 }
  0x80   :  { %v83_v35 = vpop.permute.xlu1 %82 }
  0x83   :  { %v98_v42 = vpop.permute.xlu0 %97 }
  0x84   :  { %v88_v40 = vpop.permute.xlu1 %87 }
  0x89   :  { %v78_v46 = vpop.permute.xlu1 %77  ;;  %v73_v50 = vpop.permute.xlu0 %72 }
  0x8d   :  { %v68_v60 = vpop.permute.xlu1 %67  ;;  %v63_v0 = vpop.permute.xlu0 %62 }
  0x91   :  { %v295_v9 = vpop.permute.xlu0 %294  ;;  %v300_v10 = vpop.permute.xlu1 %299 }
  0x95   :  { %v285_v15 = vpop.permute.xlu0 %284  ;;  %v290_v17 = vpop.permute.xlu1 %289 }
  0x99   :  { %v379_v28 = vpop.permute.xlu0 %378 }
 0x102   :  { %v500_v36 = vpop.f32.mrf.mxu0 }
 0x103   :  { %v240_v56 = vadd.f32 %v500_v36, %v73_v50 }
 0x104   :  { %v231_v38 = vpop.f32.mrf.mxu0 }
 0x105   :  { %v264_v1 = vmax.f32 %v240_v56, 0.0  ;;  %v232_v2 = vadd.f32 %v231_v38, %v63_v0 }
 0x106   :  { %v501_v39 = vpop.f32.mrf.mxu0 }
 0x107   :  { %v243_v52 = vadd.f32 %v501_v39, %v78_v46  ;;  %v262_v5 = vmax.f32 %v232_v2, 0.0 }
 0x108   :  { %v234_v41 = vpop.f32.mrf.mxu0 }
 0x109   :  { %v265_v61 = vmax.f32 %v243_v52, 0.0  ;;  %v235_v62 = vadd.f32 %v234_v41, %v68_v60 }
 0x10a   :  { %v504_v43 = vpop.f32.mrf.mxu0 }
 0x10b   :  { %v256_v45 = vadd.f32 %v504_v43, %v93_v37  ;;  %v275_v3 = vpack.c.bf16 %v265_v61, %v264_v1  ;;  %v263_v4 = vmax.f32 %v235_v62, 0.0 }
 0x10c   :  { %v247_v44 = vpop.f32.mrf.mxu0 }
 0x10d   :  { %v248_v48 = vadd.f32 %v247_v44, %v83_v35  ;;  %v268_v53 = vmax.f32 %v256_v45, 0.0  ;;  %v274_v6 = vpack.c.bf16 %v263_v4, %v262_v5 }
 0x10e   :  { %v505_v47 = vpop.f32.mrf.mxu0 }
 0x10f   :  { %v259_v49 = vadd.f32 %v505_v47, %v98_v42  ;;  %v266_v57 = vmax.f32 %v248_v48, 0.0 }
 0x110   :  { %v250_v51 = vpop.f32.mrf.mxu0 }
 0x111   :  { %v269_v54 = vmax.f32 %v259_v49, 0.0  ;;  %v251_v55 = vadd.f32 %v250_v51, %v88_v40 }
 0x113   :  { %v267_v58 = vmax.f32 %v251_v55, 0.0  ;;  %v277_v59 = vpack.c.bf16 %v269_v54, %v268_v53 }
 0x115   :  { %v276_v63 = vpack.c.bf16 %v267_v58, %v266_v57  ;;  %506 = vmatprep.subr.bf16.mxu1 %v277_v59 }
 0x116   :  { %507 = vmatpush3.bf16.msra.mxu1 %v277_v59 }
 0x117   :  { %508 = vmatprep.subr.bf16.mxu1 %v276_v63 }
 0x11a   :  { %509 = vmatpush3.bf16.msra.mxu1 %v276_v63 }
 0x11b   :  { %510 = vmatprep.subr.bf16.mxu1 %v275_v3 }
 0x11e   :  { %511 = vmatpush3.bf16.msra.mxu1 %v275_v3 }
 0x11f   :  { %512 = vmatprep.subr.bf16.mxu1 %v274_v6 }
 0x122   :  { %513 = vmatpush3.bf16.msra.mxu1 %v274_v6 }
 0x123   :  { %518 = vmatprep.subr.bf16.mxu1 %v577_v8 }
 0x125   :  { %515 = vmatmul.mubr.msk.bf16.vlgmr.msra.gmra.mxu1 %vm312_vm1, %v553_v7 }
 0x126   :  { %522 = vmatprep.mubr.msk.bf16.mxu1 %vm578_vm2, %v577_v8 }
 0x1e5   :  { %v516_v11 = vpop.f32.mrf.mxu1 }
 0x1e6   :  { %v362_v13 = vadd.f32 %v516_v11, %v295_v9 }
 0x1e7   :  { %v353_v12 = vpop.f32.mrf.mxu1 }
 0x1e8   :  { %v370_v19 = vmax.f32 %v362_v13, 0.0  ;;  %v354_v20 = vadd.f32 %v353_v12, %v285_v15 }
 0x1e9   :  { %v517_v14 = vpop.f32.mrf.mxu1 }
 0x1ea   :  { %v365_v16 = vadd.f32 %v517_v14, %v300_v10  ;;  %v368_v25 = vmax.f32 %v354_v20, 0.0 }
 0x1eb   :  { %v356_v18 = vpop.f32.mrf.mxu1 }
 0x1ec   :  { %v371_v21 = vmax.f32 %v365_v16, 0.0  ;;  %v357_v22 = vadd.f32 %v356_v18, %v290_v17 }
 0x1ee   :  { %v374_v23 = vpack.c.bf16 %v371_v21, %v370_v19  ;;  %v369_v24 = vmax.f32 %v357_v22, 0.0 }
 0x1f0   :  { %519 = vmatpush3.bf16.msra.mxu1 %v374_v23  ;;  %v373_v26 = vpack.c.bf16 %v369_v24, %v368_v25 }
 0x1f1   :  { %520 = vmatprep.subr.bf16.mxu1 %v577_v8 }
 0x1f4   :  { %521 = vmatpush3.bf16.msra.mxu1 %v373_v26 }
 0x1f7   :  { %523 = vmatmul.mubr.msk.bf16.vlgmr.msra.gmra.mxu1 %vm381_vm3, %v372_v27 }
 0x2b7   :  { %v419_v29 = vpop.f32.mrf.mxu1 }
 0x2b8   :  { %v420_v30 = vadd.f32 %v419_v29, %v379_v28 }
 0x2b9   :  { %v524_v31 = vpop.f32.mrf.mxu1 }
 0x2ba   :  { %425 = vst [vmem:[#allocation2] sm:$0xf] %v420_v30 }
 0x2bb   :  { %v422_v32 = vpop.f32.mrf.mxu1 }
 0x2bc   :  { %565 = shalt.err (!%p562_p4)
}
 0x2bd   :  { %435 = dma.vmem_to_hbm [thread:$0]  %s433_s29, 64, %s736_s7, [#allocation3]   ;;  %v525_v33 = vpop.f32.mrf.mxu1 }
 0x2be   :  { %574 = dma.done.wait [#allocation3], 64  }
 0x2bf   :  { %575 = vsyncadd [#allocation3], 4294967232 }
 0x2c0   :  { %439 = vsyncpa [#allocation3], 1 }

</bundles_post_ra>
